<compile_context>
chip_gen: v5e
topology: v5e:2x2
jax: 0.10.0
libtpu: 0.0.40
codegen_flags: <defaults>
</compile_context>

<pallas_src>
import jax
import jax.numpy as jnp
from jax.experimental import pallas as pl
from jax.experimental.pallas import tpu as pltpu

IN_FEATURES = 10
HIDDEN = 50
OUT_FEATURES = 1

_LANE = 128
_F32 = 4
# Per-batch-row VMEM footprint of one grid step (bytes):
#   2x double-buffered x block [tile_b, 10] (lane-padded to 128)  -> 2 * 512
#   on-chip transposed copy    [10->16, tile_b]                   ->     64
#   h intermediate             [50->56, tile_b] f32                ->    224
#   2x double-buffered output  [1->8,  tile_b]                    ->     64
_VMEM_BYTES_PER_ROW = 2 * _LANE * _F32 + 16 * _F32 + 56 * _F32 + 2 * 8 * _F32
_WEIGHT_VMEM_BYTES = 64 * 1024


def mlp_kernel(x_ref, w1_ref, b1_ref, w2_ref, b2_ref, o_ref):
    """One batch tile.

    x_ref : [tile_b, 10]  natural-layout block of x (batch on sublanes)
    w1_ref: [50, 10]      fc1.weight (out x in, PyTorch layout)
    b1_ref: [50, 1]
    w2_ref: [50, 1]       fc2.weight transposed
    b2_ref: [1, 1]
    o_ref : [1, tile_b]   lane-dense output slab (batch on lanes)
    """
    # On-chip batch-on-lanes reshuffle (XLU); replaces the old wrapper-side
    # HBM pad+transpose round trip of x.
    x_t = jnp.transpose(x_ref[...], (1, 0))                  # [10, tile_b]
    # fc1 on the MXU: [50,10] @ [10,tile_b] -> [50,tile_b], f32 accumulation.
    h = jnp.dot(w1_ref[...], x_t, preferred_element_type=jnp.float32)
    # Bias + ReLU on the VPU.  (v7x micro-opt: b1 could be folded into the
    # matmul by augmenting K=10->11; kept as an add here -- neutral on v5e/v6e.)
    h = jnp.maximum(h + b1_ref[...], 0.0)
    # fc2 (50 -> 1) on VPU + XLU: elementwise mul then cross-sublane reduce.
    # Deliberately NOT a second jnp.dot -- the vmatmul slot is already loaded.
    y = jnp.sum(h * w2_ref[...], axis=0, keepdims=True) + b2_ref[...]
    o_ref[...] = y.astype(o_ref.dtype)


def _round_up(n, m):
    return ((n + m - 1) // m) * m


def _pick_tile_b(batch, max_tile_b, vmem_budget_bytes):
    """Batch tile: multiple of 128 (lane constraint of the (1, tile_b) output
    block), >= 2 tiles when the batch allows it (v7x dual TensorCore), and
    capped by max_tile_b and the per-tile VMEM budget."""
    by_vmem = (vmem_budget_bytes - _WEIGHT_VMEM_BYTES) // _VMEM_BYTES_PER_ROW
    two_tiles = _round_up(pl.cdiv(batch, 2), _LANE)
    tile_b = min(max_tile_b, by_vmem, two_tiles)
    tile_b = max(_LANE, (tile_b // _LANE) * _LANE)
    assert tile_b % _LANE == 0, tile_b
    return tile_b


def simple_model_forward(x, w1, b1, w2, b2, *,
                         max_tile_b=16 * 1024,
                         vmem_budget_bytes=40 * 1024 * 1024):
    """x: [B, 10] float32 (natural layout). Returns [B, 1] = fc2(relu(fc1(x)))."""
    batch = x.shape[0]
    tile_b = _pick_tile_b(batch, max_tile_b, vmem_budget_bytes)
    # Ragged tail: Pallas pads the trailing block on read and masks it on write
    # (each batch row is independent), so no jnp.pad / extra HBM pass is needed.
    n_tiles = pl.cdiv(batch, tile_b)

    vmem_limit = min(
        64 * 1024 * 1024,
        max(32 * 1024 * 1024,
            int(1.5 * (tile_b * _VMEM_BYTES_PER_ROW + _WEIGHT_VMEM_BYTES))))

    flops = 2 * batch * (IN_FEATURES * HIDDEN + HIDDEN)
    bytes_accessed = (batch * (IN_FEATURES + OUT_FEATURES) * 4
                      + (HIDDEN * IN_FEATURES + 2 * HIDDEN + 1) * 4)

    out = pl.pallas_call(
        mlp_kernel,
        out_shape=jax.ShapeDtypeStruct((OUT_FEATURES, batch), jnp.float32),
        grid_spec=pltpu.PrefetchScalarGridSpec(
            num_scalar_prefetch=0,
            grid=(n_tiles,),
            in_specs=[
                pl.BlockSpec((tile_b, IN_FEATURES), lambda i: (i, 0)),
                pl.BlockSpec((HIDDEN, IN_FEATURES), lambda i: (0, 0)),
                pl.BlockSpec((HIDDEN, 1), lambda i: (0, 0)),
                pl.BlockSpec((HIDDEN, OUT_FEATURES), lambda i: (0, 0)),
                pl.BlockSpec((1, 1), lambda i: (0, 0)),
            ],
            out_specs=pl.BlockSpec((OUT_FEATURES, tile_b), lambda i: (0, i)),
        ),
        compiler_params=pltpu.CompilerParams(
            dimension_semantics=("parallel",),
            vmem_limit_bytes=vmem_limit,
        ),
        cost_estimate=pl.CostEstimate(
            flops=flops, transcendentals=0, bytes_accessed=bytes_accessed),
    )(x, w1, b1, w2, b2)

    # [1, B] -> [B, 1] is a contiguous reshape (no data movement).
    return out.reshape(batch, OUT_FEATURES)


def init_params(key):
    """Deterministic init matching nn.Linear shapes (fc1 kept in (out, in))."""
    k1, k2, k3, k4 = jax.random.split(key, 4)
    lim1 = 1.0 / jnp.sqrt(jnp.float32(IN_FEATURES))
    lim2 = 1.0 / jnp.sqrt(jnp.float32(HIDDEN))
    # PyTorch default: U(-1/sqrt(fan_in), 1/sqrt(fan_in))
    w1 = jax.random.uniform(k1, (HIDDEN, IN_FEATURES), jnp.float32, -lim1, lim1)
    b1 = jax.random.uniform(k2, (HIDDEN, 1), jnp.float32, -lim1, lim1)
    w2 = jax.random.uniform(k3, (HIDDEN, OUT_FEATURES), jnp.float32, -lim2, lim2)
    b2 = jax.random.uniform(k4, (1, 1), jnp.float32, -lim2, lim2)
    return w1, b1, w2, b2


if __name__ == "__main__":
    key = jax.random.PRNGKey(0)
    kx, kp = jax.random.split(key)
    w1, b1, w2, b2 = init_params(kp)

    def reference(x):
        h = jnp.maximum(x @ w1.T + b1.T, 0.0)
        return h @ w2 + b2

    ok = True
    # 256: two clean 128-row tiles (exercises the parallel grid axis).
    # 200: ragged trailing tile (exercises masked boundary block, no padding).
    for B in (256, 200):
        x = jax.random.normal(jax.random.fold_in(kx, B),
                              (B, IN_FEATURES), jnp.float32)
        out = jax.block_until_ready(simple_model_forward(x, w1, b1, w2, b2))
        ref = reference(x)
        ok = ok and (out.shape == (B, 1))
        ok = ok and bool(jnp.allclose(out, ref, atol=1e-5, rtol=1e-5))

    assert ok
    print("KERNEL_OK")
</pallas_src>

<mosaic_0001>
module attributes {stable_mosaic.version = 11 : i64} {
  func.func @mlp_kernel(%arg0: i32, %arg1: memref<128x10xf32, #tpu.memory_space<vmem>>, %arg2: memref<50x10xf32, #tpu.memory_space<vmem>>, %arg3: memref<50x1xf32, #tpu.memory_space<vmem>>, %arg4: memref<50x1xf32, #tpu.memory_space<vmem>>, %arg5: memref<1x1xf32, #tpu.memory_space<vmem>>, %arg6: memref<1x128xf32, #tpu.memory_space<vmem>>) attributes {dimension_semantics = [#tpu.dimension_semantics<parallel>], iteration_bounds = array<i64: 2>, scalar_prefetch = 0 : i64, scratch_operands = 0 : i64, tpu.core_type = #tpu.core_type<tc>, window_params = [{transform_indices = @transform_0, window_bounds = array<i64: 128, 10>}, {pipeline_mode = #tpu.pipeline_mode<synchronous>, transform_indices = @transform_1, window_bounds = array<i64: 50, 10>}, {pipeline_mode = #tpu.pipeline_mode<synchronous>, transform_indices = @transform_2, window_bounds = array<i64: 50, 1>}, {pipeline_mode = #tpu.pipeline_mode<synchronous>, transform_indices = @transform_3, window_bounds = array<i64: 50, 1>}, {pipeline_mode = #tpu.pipeline_mode<synchronous>, transform_indices = @transform_4, window_bounds = array<i64: 1, 1>}, {transform_indices = @transform_5, window_bounds = array<i64: 1, 128>}]} {
    %c0 = arith.constant 0 : index
    %c0_0 = arith.constant 0 : index
    %0 = vector.load %arg1[%c0, %c0_0] : memref<128x10xf32, #tpu.memory_space<vmem>>, vector<128x10xf32>
    %1 = tpu.transpose %0, [1, 0] : vector<128x10xf32> -> vector<10x128xf32>
    %c0_1 = arith.constant 0 : index
    %c0_2 = arith.constant 0 : index
    %2 = vector.load %arg2[%c0_1, %c0_2] : memref<50x10xf32, #tpu.memory_space<vmem>>, vector<50x10xf32>
    %cst = arith.constant dense<0.000000e+00> : vector<50x128xf32>
    %3 = tpu.matmul %2, %1, %cst {dimension_numbers = #tpu.dot_dimension_numbers<[1], [0], [0], [1], [0, 0, 1, 1], [], []>} : vector<50x10xf32>, vector<10x128xf32>, vector<50x128xf32> -> vector<50x128xf32>
    %c0_3 = arith.constant 0 : index
    %c0_4 = arith.constant 0 : index
    %4 = vector.load %arg3[%c0_3, %c0_4] : memref<50x1xf32, #tpu.memory_space<vmem>>, vector<50x1xf32>
    %5 = vector.broadcast %4 : vector<50x1xf32> to vector<50x128xf32>
    %6 = arith.addf %3, %5 : vector<50x128xf32>
    %cst_5 = arith.constant 0.000000e+00 : f32
    %7 = vector.broadcast %cst_5 : f32 to vector<50x128xf32>
    %8 = arith.maximumf %6, %7 : vector<50x128xf32>
    %c0_6 = arith.constant 0 : index
    %c0_7 = arith.constant 0 : index
    %9 = vector.load %arg4[%c0_6, %c0_7] : memref<50x1xf32, #tpu.memory_space<vmem>>, vector<50x1xf32>
    %10 = vector.broadcast %9 : vector<50x1xf32> to vector<50x128xf32>
    %11 = arith.mulf %8, %10 : vector<50x128xf32>
    %cst_8 = arith.constant dense<0.000000e+00> : vector<128xf32>
    %12 = vector.multi_reduction <add>, %11, %cst_8 [0] : vector<50x128xf32> to vector<128xf32>
    %13 = vector.shape_cast %12 : vector<128xf32> to vector<1x128xf32>
    %c0_9 = arith.constant 0 : index
    %c0_10 = arith.constant 0 : index
    %14 = vector.load %arg5[%c0_9, %c0_10] : memref<1x1xf32, #tpu.memory_space<vmem>>, vector<1x1xf32>
    %15 = vector.broadcast %14 : vector<1x1xf32> to vector<1x128xf32>
    %16 = arith.addf %13, %15 : vector<1x128xf32>
    %c0_11 = arith.constant 0 : index
    %c0_12 = arith.constant 0 : index
    %17 = vector.load %arg6[%c0_11, %c0_12] : memref<1x128xf32, #tpu.memory_space<vmem>>, vector<1x128xf32>
    tpu.vector_store %arg6[%c0_11, %c0_12], %16 {strides = array<i32>} : memref<1x128xf32, #tpu.memory_space<vmem>>, vector<1x128xf32>,
    return
  }
  func.func @transform_0(%arg0: i32) -> (i32, i32) {
    %c0_i32 = arith.constant 0 : i32
    %c0_i32_0 = arith.constant 0 : i32
    return %arg0, %c0_i32 : i32, i32
  }
  func.func @transform_1(%arg0: i32) -> (i32, i32) {
    %c0_i32 = arith.constant 0 : i32
    %c0_i32_0 = arith.constant 0 : i32
    %c0_i32_1 = arith.constant 0 : i32
    return %c0_i32, %c0_i32_0 : i32, i32
  }
  func.func @transform_2(%arg0: i32) -> (i32, i32) {
    %c0_i32 = arith.constant 0 : i32
    %c0_i32_0 = arith.constant 0 : i32
    %c0_i32_1 = arith.constant 0 : i32
    return %c0_i32, %c0_i32_0 : i32, i32
  }
  func.func @transform_3(%arg0: i32) -> (i32, i32) {
    %c0_i32 = arith.constant 0 : i32
    %c0_i32_0 = arith.constant 0 : i32
    %c0_i32_1 = arith.constant 0 : i32
    return %c0_i32, %c0_i32_0 : i32, i32
  }
  func.func @transform_4(%arg0: i32) -> (i32, i32) {
    %c0_i32 = arith.constant 0 : i32
    %c0_i32_0 = arith.constant 0 : i32
    %c0_i32_1 = arith.constant 0 : i32
    return %c0_i32, %c0_i32_0 : i32, i32
  }
  func.func @transform_5(%arg0: i32) -> (i32, i32) {
    %c0_i32 = arith.constant 0 : i32
    %c0_i32_0 = arith.constant 0 : i32
    return %c0_i32, %arg0 : i32, i32
  }
}

</mosaic_0001>

<bundles_post_ra>
// kernel: tpu_custom_call.1
= control target key start
LH: loop header
LB: loop body
LE: loop exit
PB: predicated region body
PF: predicated region fallthrough
CT: control target
= control target key end

     0   :  { %s1002_s0 = inlined_call_operand.vmem [shape: f32[256,10], index: 0, kind: input, shape index: {}]   ;;  %s1003_s1 = inlined_call_operand.vmem [shape: f32[50,10], index: 1, kind: input, shape index: {}]   ;;  %s1004_s2 = inlined_call_operand.vmem [shape: f32[50,1], index: 2, kind: input, shape index: {}]   ;;  %s1005_s3 = inlined_call_operand.vmem [shape: f32[50,1], index: 3, kind: input, shape index: {}]   ;;  %s1006_s4 = inlined_call_operand.<no memory space> [shape: f32[1,1], index: 4, kind: input, shape index: {}]   ;;  %s1007_s5 = inlined_call_operand.hbm [shape: f32[1,256], index: 5, kind: output, shape index: {}]  }
   0x1   :  { %v10_v0 = vstv %s1006_s4 }
   0x2   :  { %11 = vst [vmem:[#allocation2] sm:$0x1] %v10_v0 }
   0x3   :  { %12 = vsyncpa [#allocation4], 0 }
   0x4   :  { %14 = vsyncpa [#allocation4 + $0x1], 0  ;;  %s766_s20 = smov 0   ;;  %s768_s21 = smov 0  }
   0x5   :  { %s770_s22 = smov 0   ;;  %s772_s23 = smov 0  }
   0x6 LB: > { %s787_s4 = sadd.s32 4294967295, %s730_s23   ;;  %s546_s24 = sadd.s32 4294967294, %s730_s23   ;;  %s730_s23 = sphi %s772_s23, %s1013_s23   ;;  %s726_s22 = sphi %s770_s22, %s1012_s22   ;;  %s722_s21 = sphi %s768_s21, %s1011_s21   ;;  %s718_s20 = sphi %s766_s20, %s1010_s20  }
   0x7   : > { %s791_s25 = sadd.s32 1, %s730_s23   ;;  %s137_s26 = sadd.s32 1, %s726_s22 }
   0x8   : > { %s134_s27 = ssub.s32 %s730_s23, %s791_s25  ;;  %p147_p0 = scmp.ne.s32.totalorder %s726_s22, %s722_s21 }
   0x9   : > { %p135_p1 = scmp.eq.s32.totalorder %s134_s27, 0  ;;  %p148_p2 = scmp.eq.s32.totalorder %s787_s4, 1 }
   0xa   : > { %p153_p3 = scmp.ne.s32.totalorder %s722_s21, %s718_s20  ;;  %p154_p4 = scmp.eq.s32.totalorder %s546_s24, 1 }
   0xb   : > { %s802_s28 = scalar_select %p135_p1, %s726_s22, %s137_s26  }
   0xc   : > { %p804_p5 = por %p148_p2, %p147_p0  ;;  %p808_p6 = por %p154_p4, %p153_p3 }
   0xd   : > { %p549_p7 = scmp.ge.s32.totalorder %s730_s23, 1  ;;  %p193_p8 = scmp.lt.s32.totalorder %s730_s23, 3 }
   0xf   : > { %p194_p9 = pnand %p549_p7, %p193_p8 }
  0x10   : > { %s550_s6 = sshll.u32 (!%p194_p9), %s787_s4, 4  ;;  %s218_s24 = sand.u32 (!%p194_p9), 1, %s722_s21  }
  0x11   : > { %197 = sbr.rel (%p194_p9) target bundleno = 259 (0x103), region = 40  ;;  %p221_p10 = scmp.lt.s32.totalorder (!%p194_p9), %s550_s6, 31 }
  0x12   : > { %s479_s10 = scalar_lea.sflag (!%p194_p9), [#allocation4], %s218_s24  ;;  %s688_s13 = scalar_lea.hbm (!%p194_p9), %s1007_s5, 2 }
  0x16   : > { %s1015_s6 = smov (!%p221_p10, %s550_s6), 31  ;;  %vm291_vm0 = vcmask 80896   ;;  %v249_v1 = vld [vmem:[%s1004_s2] sm:$0xff]  ;;  %v251_v2 = vld [vmem:[%s1004_s2 + $0x10] sm:$0xff]  ;;  %v732_v3 = vmov 0   ;;  %v250_v7 = vld [vmem:[%s1004_s2 + $0x8] sm:$0xff] }
  0x17   : > { %s551_s7 = sshll.u32 %s1015_s6, 3  ;;  %665 = vset.pattern.permute.xlu0 %v732_v3  ;;  %666 = vset.pattern.permute.xlu1 %v732_v3  ;;  %v252_v8 = vld [vmem:[%s1004_s2 + $0x18] sm:$0xff]  ;;  %v253_v11 = vld [vmem:[%s1004_s2 + $0x20] sm:$0xff]  ;;  %v408_v12 = vld [vmem:[%s1005_s3 + $0x10] sm:$0xff]  ;;  %vm460_vm1 = vcmask 1041408   ;;  %s487_s6 = scalar_lea.hbm %s1007_s5, %s787_s4 }
  0x18   : > { %s824_s14 = scalar_lea.vmem %s1002_s0, %s551_s7  ;;  %258 = vperm.xlu0 %665, %v249_v1   ;;  %268 = vperm.xlu1 %666, %v251_v2   ;;  %v409_v15 = vld [vmem:[%s1005_s3 + $0x18] sm:$0xff]  ;;  %v255_v16 = vld [vmem:[%s1004_s2 + $0x30] sm:$0x3]  ;;  %v406_v18 = vld [vmem:[%s1005_s3] sm:$0xff]  ;;  %s219_s7 = scalar_lea.vmem [#allocation3], %s218_s24 }
  0x19   : > { %v241_v4 = vld [vmem:[%s824_s14 + $0x78] sm:$0xff]  ;;  %v240_v5 = vld [vmem:[%s824_s14 + $0x70] sm:$0xff]  ;;  %667 = vset.pattern.permute.xlu2 %v732_v3  ;;  %v239_v6 = vld [vmem:[%s824_s14 + $0x68] sm:$0xff]  ;;  %s489_s8 = sshll.u32 %s219_s7, 4  ;;  %s491_s9 = sshll.u32 %s487_s6, 4  ;;  %s490_s8 = int_to_ptr.vmem [resolvable:$true] %s489_s8  ;;  %s492_s9 = int_to_ptr.hbm [resolvable:$true] %s491_s9 }
  0x1a   : > { %552 = vmatpush.xpose.msk.msra.mxu0 %vm291_vm0, %v241_v4  ;;  %577 = vmatpush.xpose.msk.msra.mxu1 %vm291_vm0, %v241_v4  ;;  %v238_v9 = vld [vmem:[%s824_s14 + $0x60] sm:$0xff]  ;;  %v237_v10 = vld [vmem:[%s824_s14 + $0x58] sm:$0xff]  ;;  %v236_v13 = vld [vmem:[%s824_s14 + $0x50] sm:$0xff]  ;;  %s682_s11 = sshra.s32 %s492_s9, 4  ;;  %s683_s11 = int_to_ptr.hbm [resolvable:$true] %s682_s11 }
  0x1b   : > { %578 = vmatpush.xpose.msk.msra.mxu2 %vm291_vm0, %v241_v4  ;;  %579 = vmatpush.xpose.msk.msra.mxu3 %vm291_vm0, %v241_v4  ;;  %v235_v14 = vld [vmem:[%s824_s14 + $0x48] sm:$0xff]  ;;  %v234_v17 = vld [vmem:[%s824_s14 + $0x40] sm:$0xff]  ;;  %v233_v19 = vld [vmem:[%s824_s14 + $0x38] sm:$0xff]  ;;  %p689_p0 = scmp.lt.s32.totalorder %s683_s11, %s1007_s5 }
  0x1c   : > { %415 = vperm.xlu2 %667, %v406_v18   ;;  %v411_v20 = vld [vmem:[%s1005_s3 + $0x28] sm:$0xff]  ;;  %v412_v21 = vld [vmem:[%s1005_s3 + $0x30] sm:$0x3]  ;;  %v230_v26 = vld [vmem:[%s824_s14 + $0x20] sm:$0xff] }
  0x1d   : > { %v407_v22 = vld [vmem:[%s1005_s3 + $0x8] sm:$0xff]  ;;  %v232_v23 = vld [vmem:[%s824_s14 + $0x30] sm:$0xff]  ;;  %v229_v27 = vld [vmem:[%s824_s14 + $0x18] sm:$0xff] }
  0x1e   : > { %553 = vmatpush.xpose.msk.msra.mxu0 %vm291_vm0, %v240_v5  ;;  %580 = vmatpush.xpose.msk.msra.mxu1 %vm291_vm0, %v240_v5  ;;  %v231_v24 = vld [vmem:[%s824_s14 + $0x28] sm:$0xff]  ;;  %v410_v28 = vld [vmem:[%s1005_s3 + $0x20] sm:$0xff]  ;;  %v228_v29 = vld [vmem:[%s824_s14 + $0x10] sm:$0xff] }
  0x1f   : > { %581 = vmatpush.xpose.msk.msra.mxu2 %vm291_vm0, %v240_v5  ;;  %582 = vmatpush.xpose.msk.msra.mxu3 %vm291_vm0, %v240_v5  ;;  %v254_v25 = vld [vmem:[%s1004_s2 + $0x28] sm:$0xff]  ;;  %v469_v31 = vld [vmem:[#allocation2] sm:$0x1]  ;;  %v244_v34 = vld [vmem:[%s1003_s1 + $0x10] sm:$0xff] }
  0x20   : > { %263 = vperm.xlu0 %665, %v250_v7   ;;  %273 = vperm.xlu1 %666, %v252_v8   ;;  %v227_v30 = vld [vmem:[%s824_s14 + $0x8] sm:$0xff]  ;;  %v226_v32 = vld [vmem:[%s824_s14] sm:$0xff]  ;;  %v245_v35 = vld [vmem:[%s1003_s1 + $0x18] sm:$0xff]  ;;  %s684_s14 = scalar_lea.hbm %s683_s11, 1 }
  0x21   : > { %v242_v33 = vld [vmem:[%s1003_s1] sm:$0xff]  ;;  %v247_v36 = vld [vmem:[%s1003_s1 + $0x28] sm:$0xff]  ;;  %v248_v39 = vld [vmem:[%s1003_s1 + $0x30] sm:$0x3]  ;;  %p685_p11 = scmp.ne.s32.totalorder %s683_s11, %s684_s14  ;;  %p690_p1 = scmp.lt.s32.totalorder %s688_s13, %s684_s14 }
  0x22   : > { %554 = vmatpush.xpose.msk.msra.mxu0 %vm291_vm0, %v239_v6  ;;  %583 = vmatpush.xpose.msk.msra.mxu1 %vm291_vm0, %v239_v6  ;;  %v243_v37 = vld [vmem:[%s1003_s1 + $0x8] sm:$0xff]  ;;  %v246_v38 = vld [vmem:[%s1003_s1 + $0x20] sm:$0xff] }
  0x23   : > { %584 = vmatpush.xpose.msk.msra.mxu2 %vm291_vm0, %v239_v6  ;;  %585 = vmatpush.xpose.msk.msra.mxu3 %vm291_vm0, %v239_v6  ;;  %p686_p12 = pnand %p685_p11, %p804_p5  ;;  %p691_p2 = por %p690_p1, %p689_p0 }
  0x24   : > { %420 = vperm.xlu2 %667, %v407_v22  }
  0x25   : > { %p687_p13 = pneg %p686_p12 }
  0x26   : > { %555 = vmatpush.xpose.msk.msra.mxu0 %vm291_vm0, %v238_v9  ;;  %586 = vmatpush.xpose.msk.msra.mxu1 %vm291_vm0, %v238_v9 }
  0x27   : > { %587 = vmatpush.xpose.msk.msra.mxu2 %vm291_vm0, %v238_v9  ;;  %588 = vmatpush.xpose.msk.msra.mxu3 %vm291_vm0, %v238_v9  ;;  %p692_p3 = pnand %p691_p2, %p687_p13 }
  0x28   : > { %278 = vperm.xlu0 %665, %v253_v11   ;;  %425 = vperm.xlu1 %666, %v408_v12  }
  0x2a   : > { %556 = vmatpush.xpose.msk.msra.mxu0 %vm291_vm0, %v237_v10  ;;  %589 = vmatpush.xpose.msk.msra.mxu1 %vm291_vm0, %v237_v10 }
  0x2b   : > { %590 = vmatpush.xpose.msk.msra.mxu2 %vm291_vm0, %v237_v10  ;;  %591 = vmatpush.xpose.msk.msra.mxu3 %vm291_vm0, %v237_v10 }
  0x2c   : > { %283 = vperm.xlu2 %667, %v254_v25  }
  0x2e   : > { %557 = vmatpush.xpose.msk.msra.mxu0 %vm291_vm0, %v236_v13  ;;  %592 = vmatpush.xpose.msk.msra.mxu1 %vm291_vm0, %v236_v13 }
  0x2f   : > { %593 = vmatpush.xpose.msk.msra.mxu2 %vm291_vm0, %v236_v13  ;;  %594 = vmatpush.xpose.msk.msra.mxu3 %vm291_vm0, %v236_v13 }
  0x30   : > { %430 = vperm.xlu0 %665, %v409_v15   ;;  %288 = vperm.xlu1 %666, %v255_v16  }
  0x32   : > { %558 = vmatpush.xpose.msk.msra.mxu0 %vm291_vm0, %v235_v14  ;;  %595 = vmatpush.xpose.msk.msra.mxu1 %vm291_vm0, %v235_v14 }
  0x33   : > { %596 = vmatpush.xpose.msk.msra.mxu2 %vm291_vm0, %v235_v14  ;;  %597 = vmatpush.xpose.msk.msra.mxu3 %vm291_vm0, %v235_v14 }
  0x34   : > { %435 = vperm.xlu2 %667, %v410_v28  }
  0x36   : > { %559 = vmatpush.xpose.msk.msra.mxu0 %vm291_vm0, %v234_v17  ;;  %598 = vmatpush.xpose.msk.msra.mxu1 %vm291_vm0, %v234_v17 }
  0x37   : > { %599 = vmatpush.xpose.msk.msra.mxu2 %vm291_vm0, %v234_v17  ;;  %600 = vmatpush.xpose.msk.msra.mxu3 %vm291_vm0, %v234_v17 }
  0x38   : > { %440 = vperm.xlu0 %665, %v411_v20   ;;  %445 = vperm.xlu1 %666, %v412_v21  }
  0x3a   : > { %560 = vmatpush.xpose.msk.msra.mxu0 %vm291_vm0, %v233_v19  ;;  %601 = vmatpush.xpose.msk.msra.mxu1 %vm291_vm0, %v233_v19 }
  0x3b   : > { %602 = vmatpush.xpose.msk.msra.mxu2 %vm291_vm0, %v233_v19  ;;  %603 = vmatpush.xpose.msk.msra.mxu3 %vm291_vm0, %v233_v19 }
  0x3c   : > { %472 = vperm.xlu2 %667, %v469_v31  }
  0x3e   : > { %561 = vmatpush.xpose.msk.msra.mxu0 %vm291_vm0, %v232_v23  ;;  %604 = vmatpush.xpose.msk.msra.mxu1 %vm291_vm0, %v232_v23 }
  0x3f   : > { %605 = vmatpush.xpose.msk.msra.mxu2 %vm291_vm0, %v232_v23  ;;  %606 = vmatpush.xpose.msk.msra.mxu3 %vm291_vm0, %v232_v23 }
  0x42   : > { %562 = vmatpush.xpose.msk.msra.mxu0 %vm291_vm0, %v231_v24  ;;  %607 = vmatpush.xpose.msk.msra.mxu1 %vm291_vm0, %v231_v24 }
  0x43   : > { %608 = vmatpush.xpose.msk.msra.mxu2 %vm291_vm0, %v231_v24  ;;  %609 = vmatpush.xpose.msk.msra.mxu3 %vm291_vm0, %v231_v24 }
  0x46   : > { %563 = vmatpush.xpose.msk.msra.mxu0 %vm291_vm0, %v230_v26  ;;  %610 = vmatpush.xpose.msk.msra.mxu1 %vm291_vm0, %v230_v26 }
  0x47   : > { %611 = vmatpush.xpose.msk.msra.mxu2 %vm291_vm0, %v230_v26  ;;  %612 = vmatpush.xpose.msk.msra.mxu3 %vm291_vm0, %v230_v26 }
  0x4a   : > { %564 = vmatpush.xpose.msk.msra.mxu0 %vm291_vm0, %v229_v27  ;;  %613 = vmatpush.xpose.msk.msra.mxu1 %vm291_vm0, %v229_v27 }
  0x4b   : > { %614 = vmatpush.xpose.msk.msra.mxu2 %vm291_vm0, %v229_v27  ;;  %615 = vmatpush.xpose.msk.msra.mxu3 %vm291_vm0, %v229_v27 }
  0x4e   : > { %565 = vmatpush.xpose.msk.msra.mxu0 %vm291_vm0, %v228_v29  ;;  %616 = vmatpush.xpose.msk.msra.mxu1 %vm291_vm0, %v228_v29 }
  0x4f   : > { %617 = vmatpush.xpose.msk.msra.mxu2 %vm291_vm0, %v228_v29  ;;  %618 = vmatpush.xpose.msk.msra.mxu3 %vm291_vm0, %v228_v29 }
  0x52   : > { %566 = vmatpush.xpose.msk.msra.mxu0 %vm291_vm0, %v227_v30  ;;  %619 = vmatpush.xpose.msk.msra.mxu1 %vm291_vm0, %v227_v30 }
  0x53   : > { %620 = vmatpush.xpose.msk.msra.mxu2 %vm291_vm0, %v227_v30  ;;  %621 = vmatpush.xpose.msk.msra.mxu3 %vm291_vm0, %v227_v30 }
  0x56   : > { %567 = vmatpush.xpose.msk.msra.mxu0 %vm291_vm0, %v226_v32  ;;  %622 = vmatpush.xpose.msk.msra.mxu1 %vm291_vm0, %v226_v32 }
  0x57   : > { %623 = vmatpush.xpose.msk.msra.mxu2 %vm291_vm0, %v226_v32  ;;  %624 = vmatpush.xpose.msk.msra.mxu3 %vm291_vm0, %v226_v32 }
  0x59   : > { %568 = vmatmul.msk.f32.vlgmr.msra.gmra.mxu0 %vm291_vm0, %v242_v33  ;;  %570 = vmatmul.msk.f32.vlgmr.msra.gmra.mxu1 %vm291_vm0, %v244_v34 }
  0x5a   : > { %571 = vmatmul.msk.f32.vlgmr.msra.gmra.mxu2 %vm291_vm0, %v245_v35  ;;  %573 = vmatmul.msk.f32.vlgmr.msra.gmra.mxu3 %vm291_vm0, %v247_v36 }
  0x61   : > { %569 = vmatmul.msk.f32.gmra.mxu0 %vm291_vm0, %v243_v37 }
  0x62   : > { %572 = vmatmul.msk.f32.gmra.mxu2 %vm291_vm0, %v246_v38  ;;  %574 = vmatmul.msk.f32.gmra.mxu3 %vm291_vm0, %v248_v39 }
  0x76   : > { %v416_v42 = vpop.permute.xlu2 %415 }
  0x7e   : > { %v421_v45 = vpop.permute.xlu2 %420 }
  0x86   : > { %v284_v55 = vpop.permute.xlu2 %283 }
  0x8a   : > { %v269_v40 = vpop.permute.xlu1 %268  ;;  %v259_v41 = vpop.permute.xlu0 %258 }
  0x8e   : > { %v436_v14 = vpop.permute.xlu2 %435 }
  0x92   : > { %v274_v43 = vpop.permute.xlu1 %273  ;;  %v264_v44 = vpop.permute.xlu0 %263 }
  0x96   : > { %v473_v29 = vpop.permute.xlu2 %472 }
  0x97   : > { %v475_v31 = vperm.slane %v473_v29, 0 }
  0x9a   : > { %v426_v46 = vpop.permute.xlu1 %425  ;;  %v279_v48 = vpop.permute.xlu0 %278 }
  0xa2   : > { %v289_v59 = vpop.permute.xlu1 %288  ;;  %v431_v60 = vpop.permute.xlu0 %430 }
  0xaa   : > { %v446_v16 = vpop.permute.xlu1 %445  ;;  %v441_v18 = vpop.permute.xlu0 %440 }
  0xd6   : > { %v378_v47 = vpop.f32.mrf.mxu0  ;;  %v384_v49 = vpop.f32.mrf.mxu1 }
  0xd7   : > { %v379_v50 = vadd.f32 %v378_v47, %v259_v41  ;;  %v385_v51 = vadd.f32 %v384_v49, %v269_v40 }
  0xd9   : > { %v399_v56 = vmax.f32 %v379_v50, 0.0  ;;  %v401_v61 = vmax.f32 %v385_v51, 0.0 }
  0xdb   : > { %v448_v63 = vmul.f32 %v416_v42, %v399_v56  ;;  %v450_v3 = vmul.f32 %v426_v46, %v401_v61 }
  0xdd   : > { %v387_v52 = vpop.f32.mrf.mxu2  ;;  %v393_v53 = vpop.f32.mrf.mxu3 }
  0xde   : > { %v381_v54 = vpop.f32.mrf.mxu0  ;;  %v388_v57 = vadd.f32 %v387_v52, %v274_v43  ;;  %v394_v2 = vadd.f32 %v393_v53, %v284_v55 }
  0xdf   : > { %v382_v58 = vadd.f32 %v381_v54, %v264_v44 }
  0xe0   : > { %v402_v0 = vmax.f32 %v388_v57, 0.0  ;;  %v404_v11 = vmax.f32 %v394_v2, 0.0 }
  0xe1   : > { %v400_v62 = vmax.f32 %v382_v58, 0.0 }
  0xe2   : > { %v451_v9 = vmul.f32 %v431_v60, %v402_v0  ;;  %v453_v20 = vmul.f32 %v441_v18, %v404_v11 }
  0xe3   : > { %v449_v1 = vmul.f32 %v421_v45, %v400_v62 }
  0xe5   : > { %v455_v4 = vadd.f32 %v449_v1, %v448_v63  ;;  %v390_v5 = vpop.f32.mrf.mxu2  ;;  %v396_v6 = vpop.f32.mrf.mxu3 }
  0xe6   : > { %v391_v7 = vadd.f32 %v390_v5, %v279_v48  ;;  %v397_v8 = vadd.f32 %v396_v6, %v289_v59 }
  0xe7   : > { %v456_v10 = vadd.f32 %v455_v4, %v450_v3 }
  0xe8   : > { %v403_v12 = vmax.f32 %v391_v7, 0.0  ;;  %v405_v13 = vmax.f32 %v397_v8, 0.0 }
  0xe9   : > { %v457_v15 = vadd.f32 %v456_v10, %v451_v9 }
  0xea   : > { %v452_v17 = vmul.f32 %v436_v14, %v403_v12  ;;  %v454_v19 = vmul.f32 %v446_v16, %v405_v13 }
  0xec   : > { %v458_v21 = vadd.f32 %v457_v15, %v452_v17  ;;  %v461_v23 = vsel %vm460_vm1, %v454_v19, 0.0 }
  0xee   : > { %v459_v22 = vadd.f32 %v458_v21, %v453_v20 }
  0xf0   : > { %v462_v24 = vadd.f32 %v461_v23, %v459_v22 }
  0xf2   : > { %v463_v25 = vrot.slane %v462_v24, 4 }
  0xf4   : > { %v464_v26 = vadd.f32 %v463_v25, %v462_v24 }
  0xf6   : > { %v465_v27 = vrot.slane %v464_v26, 2 }
  0xf8   : > { %v466_v28 = vadd.f32 %v465_v27, %v464_v26 }
  0xfa   : > { %v467_v30 = vrot.slane %v466_v28, 1 }
  0xfc   : > { %v468_v32 = vadd.f32 %v467_v30, %v466_v28 }
  0xfe   : > { %v476_v33 = vadd.f32 %v475_v31, %v468_v32 }
 0x100   : > { %477 = vst [vmem:[%s219_s7] sm:$0x1] %v476_v33 }
 0x101   : > { %695 = shalt.err (!%p692_p3)
}
 0x102   : > { %625 = dma.vmem_to_hbm [thread:$0]  (%p804_p5), %s490_s8, 16, %s492_s9, %s479_s10  }
 0x103 PF: > { %p631_p4 = scmp.ge.s32.totalorder %s730_s23, 2  ;;  %s503_s17 = sand.u32 1, %s718_s20  }
 0x104   : > { %s504_s18 = scalar_lea.sflag [#allocation4], %s503_s17 }
 0x105   : > { %p628_p7 = pnand %p631_p4, %p808_p6 }
 0x107   : > { %p629_p8 = pneg %p628_p7 }
 0x109   : > { %713 = dma.done.wait (%p629_p8), %s504_s18, 16  }
 0x10a   : > { %715 = vsyncadd (%p629_p8), %s504_s18, 4294967280  ;;  %p17_p9 = scmp.ge.s32.totalorder %s791_s25, 4   ;;  %s1010_s20 = smov %s722_s21 }
 0x10b   : > { %s1011_s21 = smov %s726_s22  ;;  %s1012_s22 = smov %s802_s28 }
 0x10c   : > { %s1013_s23 = smov %s791_s25  ;;  %19 = sbr.rel (!%p17_p9) target bundleno = 6 (0x6), region = 75 }
 0x111   :  { %509 = vsyncpa [#allocation4], 1 }
 0x112   :  { %511 = vsyncpa [#allocation4 + $0x1], 1 }

</bundles_post_ra>
